<compile_context>
chip_gen: v6e
topology: v6e:2x2x1
jax: 0.10.0
libtpu: 0.0.40
codegen_flags: <defaults>
</compile_context>

<pallas_src>
import jax
import jax.numpy as jnp
from jax import lax
from jax.experimental import pallas as pl
from jax.experimental.pallas import tpu as pltpu


def _round_up(x: int, m: int) -> int:
    return (x + m - 1) // m * m


def _embed_kernel(idx_ref, table_ref, out_ref):
    """idx_ref: VMEM (TN, 1) int32; table_ref: VMEM (V, D); out_ref: VMEM (TN, D).

    Vectorized gather via exact one-hot matmul on the otherwise-idle MXU.
    Out-of-range / padded indices produce all-zero rows (no OOB VMEM read
    possible — the one-hot simply has no matching column).
    """
    tn = out_ref.shape[0]
    v = table_ref.shape[0]
    idx = idx_ref[...]                                        # (TN, 1) int32
    col = lax.broadcasted_iota(jnp.int32, (tn, v), 1)         # (TN, V)
    one_hot = (col == idx).astype(table_ref.dtype)            # exact 0/1 selector
    out_ref[...] = jnp.dot(
        one_hot,
        table_ref[...],
        preferred_element_type=jnp.float32,
        precision=lax.Precision.HIGHEST,                      # keep gather bit-exact
    ).astype(out_ref.dtype)


def sentence2mat(indexes: jax.Array, table: jax.Array, *, block_n: int = 512) -> jax.Array:
    """Pallas equivalent of Sentence2Mat.forward: table[indexes].

    indexes: (N,) int32 word indices.
    table:   (V, D) float32 embedding table (small, VMEM-resident).
    returns: (N, D) float32.
    block_n: row-tile size for large N. 512 is a good default everywhere;
             v7x prefers 1024-2048, v5e saturates around 256-512.
    """
    n = indexes.shape[0]
    v, d = table.shape
    if n == 0:
        return jnp.zeros((0, d), table.dtype)

    # Resident-table one-hot path only for small vocabularies: table must fit
    # comfortably in VMEM (single-buffered) and the (TN, V) one-hot must stay a
    # small fraction of the vreg file / VALU budget.
    table_bytes = v * d * table.dtype.itemsize
    assert table_bytes <= 8 * 1024 * 1024 and v <= 2048, (
        "table too large for VMEM-resident one-hot gather; use HBM row-gather path")

    idx = indexes.astype(jnp.int32)

    if n <= block_n:
        # Single tile: block shape == full array dims (allowed even when n % 8 != 0),
        # so no padding and no post-kernel slice/copy.
        tn = n
        n_pad = n
    else:
        # Multi-tile: lane/sublane-dense tiles of block_n rows (multiple of 8),
        # pad the ragged tail (padded rows gather nothing -> zeros, sliced off).
        tn = _round_up(block_n, 8)
        n_pad = _round_up(n, tn)
        if n_pad != n:
            idx = jnp.pad(idx, (0, n_pad - n))

    idx2d = idx.reshape(n_pad, 1)
    grid = (n_pad // tn,)

    # Accurate scoped-VMEM budget: table (single-buffered) + double-buffered
    # idx/out tiles + compiler scratch slack.
    vmem_bytes = (
        table_bytes
        + 2 * tn * d * table.dtype.itemsize
        + 2 * tn * 4
        + (1 << 20)
    )
    vmem_limit = min(max(vmem_bytes, 4 * 1024 * 1024), 32 * 1024 * 1024)

    out = pl.pallas_call(
        _embed_kernel,
        out_shape=jax.ShapeDtypeStruct((n_pad, d), table.dtype),
        grid=grid,
        in_specs=[
            # Index column tile (one vector load per step).
            pl.BlockSpec((tn, 1), lambda i: (i, 0)),
            # Full table, resident across the grid; constant block index =>
            # fetched once, single-buffered to halve its VMEM footprint.
            pl.BlockSpec((v, d), lambda i: (0, 0), pipeline_mode=pl.Buffered(1)),
        ],
        out_specs=pl.BlockSpec((tn, d), lambda i: (i, 0)),
        compiler_params=pltpu.CompilerParams(
            dimension_semantics=("parallel",),   # rows split across TCs on v7x
            vmem_limit_bytes=vmem_limit,
        ),
        cost_estimate=pl.CostEstimate(
            flops=2 * n_pad * v * d,             # one-hot MXU gather
            transcendentals=0,
            bytes_accessed=n_pad * d * table.dtype.itemsize + n_pad * 4 + table_bytes,
        ),
    )(idx2d, table)

    if n_pad != n:
        out = out[:n]
    return out


if __name__ == "__main__":
    # ---- synthetic "PretrainedWord2Vec" setup (deterministic, in-script) ----
    vocab = ["<pad>", "the", "cat", "sat", "on", "a", "mat", "dog", "ran",
             "fast", "slow", "big", "small", "red", "blue", "green"]
    word2index = {w: i for i, w in enumerate(vocab)}
    word_vec_size = 128                     # lane-aligned hidden size
    vocab_size = len(vocab)                 # 16

    # nn.init.uniform_(weight, -0.25, 0.25) equivalent, deterministic.
    key = jax.random.PRNGKey(0)
    embeddings = jax.random.uniform(
        key, (vocab_size, word_vec_size), dtype=jnp.float32,
        minval=-0.25, maxval=0.25)

    # ---- forward: sentence -> indices -> embedding rows ----
    sentence = ["the", "cat", "sat", "on", "a", "big", "red", "mat"]   # 8 words
    indexes = jnp.asarray([word2index[w] for w in sentence], dtype=jnp.int32)

    out = jax.block_until_ready(sentence2mat(indexes, embeddings))
    ref = embeddings[indexes]
    assert out.shape == (len(sentence), word_vec_size)
    assert jnp.array_equal(out, ref), "mismatch vs reference gather"

    # ragged (non-multiple-of-8) sentence exercises the single-tile no-pad path
    sentence2 = ["a", "small", "blue", "dog", "ran"]                   # 5 words
    indexes2 = jnp.asarray([word2index[w] for w in sentence2], dtype=jnp.int32)
    out2 = jax.block_until_ready(sentence2mat(indexes2, embeddings))
    assert out2.shape == (len(sentence2), word_vec_size)
    assert jnp.array_equal(out2, embeddings[indexes2]), "mismatch on ragged sentence"

    # longer-than-one-tile sentence exercises the multi-tile + ragged-tail path
    key_idx = jax.random.PRNGKey(1)
    long_idx = jax.random.randint(key_idx, (1037,), 0, vocab_size, dtype=jnp.int32)
    out3 = jax.block_until_ready(sentence2mat(long_idx, embeddings))
    assert out3.shape == (1037, word_vec_size)
    assert jnp.array_equal(out3, embeddings[long_idx]), "mismatch on long sentence"

    print("KERNEL_OK")
</pallas_src>

<mosaic_0001>
module attributes {stable_mosaic.version = 11 : i64} {
  func.func @_embed_kernel(%arg0: i32, %arg1: memref<8x1xi32, #tpu.memory_space<vmem>>, %arg2: memref<16x128xf32, #tpu.memory_space<vmem>>, %arg3: memref<8x128xf32, #tpu.memory_space<vmem>>) attributes {dimension_semantics = [#tpu.dimension_semantics<parallel>], iteration_bounds = array<i64: 1>, scalar_prefetch = 0 : i64, scratch_operands = 0 : i64, tpu.core_type = #tpu.core_type<tc>, window_params = [{transform_indices = @transform_0, window_bounds = array<i64: 8, 1>}, {pipeline_mode = #tpu.pipeline_mode<synchronous>, transform_indices = @transform_1, window_bounds = array<i64: 16, 128>}, {transform_indices = @transform_2, window_bounds = array<i64: 8, 128>}]} {
    %c0 = arith.constant 0 : index
    %c0_0 = arith.constant 0 : index
    %0 = vector.load %arg1[%c0, %c0_0] : memref<8x1xi32, #tpu.memory_space<vmem>>, vector<8x1xi32>
    %1 = tpu.iota {dimensions = array<i32: 1>} : vector<8x16xi32>
    %2 = vector.broadcast %0 : vector<8x1xi32> to vector<8x16xi32>
    %3 = arith.cmpi eq, %1, %2 : vector<8x16xi32>
    %4 = arith.extui %3 : vector<8x16xi1> to vector<8x16xi32>
    %5 = arith.sitofp %4 : vector<8x16xi32> to vector<8x16xf32>
    %c0_1 = arith.constant 0 : index
    %c0_2 = arith.constant 0 : index
    %6 = vector.load %arg2[%c0_1, %c0_2] : memref<16x128xf32, #tpu.memory_space<vmem>>, vector<16x128xf32>
    %cst = arith.constant dense<0.000000e+00> : vector<8x128xf32>
    %7 = tpu.matmul %5, %6, %cst {dimension_numbers = #tpu.dot_dimension_numbers<[1], [0], [0], [1], [0, 0, 1, 1], [], []>, precision = #tpu.contract_precision<fp32>} : vector<8x16xf32>, vector<16x128xf32>, vector<8x128xf32> -> vector<8x128xf32>
    %c0_3 = arith.constant 0 : index
    %c0_4 = arith.constant 0 : index
    %8 = vector.load %arg3[%c0_3, %c0_4] : memref<8x128xf32, #tpu.memory_space<vmem>>, vector<8x128xf32>
    tpu.vector_store %arg3[%c0_3, %c0_4], %7 {strides = array<i32>} : memref<8x128xf32, #tpu.memory_space<vmem>>, vector<8x128xf32>,
    return
  }
  func.func @transform_0(%arg0: i32) -> (i32, i32) {
    %c0_i32 = arith.constant 0 : i32
    %c0_i32_0 = arith.constant 0 : i32
    return %arg0, %c0_i32 : i32, i32
  }
  func.func @transform_1(%arg0: i32) -> (i32, i32) {
    %c0_i32 = arith.constant 0 : i32
    %c0_i32_0 = arith.constant 0 : i32
    %c0_i32_1 = arith.constant 0 : i32
    return %c0_i32, %c0_i32_0 : i32, i32
  }
  func.func @transform_2(%arg0: i32) -> (i32, i32) {
    %c0_i32 = arith.constant 0 : i32
    %c0_i32_0 = arith.constant 0 : i32
    return %arg0, %c0_i32 : i32, i32
  }
}

</mosaic_0001>

<bundles_post_ra>
// kernel: tpu_custom_call.1
= control target key start
LH: loop header
LB: loop body
LE: loop exit
PB: predicated region body
PF: predicated region fallthrough
CT: control target
= control target key end

     0   :  { %7 = vsyncpa [#allocation3], 0  ;;  %s673_s0 = inlined_call_operand.vmem [shape: s32[8,1], index: 0, kind: input, shape index: {}]   ;;  %s674_s1 = inlined_call_operand.hbm [shape: f32[16,128], index: 1, kind: input, shape index: {}]   ;;  %s675_s2 = inlined_call_operand.hbm [shape: f32[8,128], index: 2, kind: output, shape index: {}]  }
   0x1   :  { %8 = vsyncpa [#allocation4], 0  ;;  %s632_s9 = smov [#allocation2]  }
   0x2   :  { %s16_s10 = sshll.u32 %s632_s9, 4  ;;  %s17_s10 = int_to_ptr.vmem [resolvable:$true] %s16_s10 }
   0x3   :  { %s596_s11 = scalar_lea.vmem %s17_s10, 256  ;;  %p601_p1 = scmp.lt.s32.totalorder %s17_s10, %s17_s10 }
   0x4   :  { %p597_p0 = scmp.ne.s32.totalorder %s17_s10, %s596_s11  ;;  %p602_p2 = scmp.lt.s32.totalorder %s596_s11, %s596_s11 }
   0x6   :  { %p603_p3 = por %p602_p2, %p601_p1 }
   0x8   :  { %p604_p4 = pnand %p603_p3, %p597_p0 }
   0xa   :  { %607 = shalt.err (!%p604_p4)
}
   0xb   :  { %s633_s12 = smov 128   ;;  %s634_s13 = smov 8  }
   0xc   :  { %22 = dma.hbm_to_vmem [thread:$0]  %s674_s1, 256, %s17_s10, [#allocation3], %s633_s12, %s633_s12, %s634_s13  }
   0xd   :  { %628 = dma.done.wait [#allocation3], 256  }
   0xe   :  { %629 = vsyncadd [#allocation3], 4294967040  ;;  %v635_v0 = vmov 0   ;;  %v636_v1 = vmov 0.0   ;;  %vm637_vm0 = vmmov 0   ;;  %v26_v2 = vld [vmem:[%s673_s0] sm:$0xff]  ;;  %v27_v15 = vlaneseq }
   0xf   :  { %587 = vset.pattern.permute.xlu0 %v635_v0  ;;  %545 = vmatprep.subr.mxu1 %v636_v1  ;;  %v36_v3 = vld [vmem:[#allocation2 + $0x8] sm:$0xff]  ;;  %v35_v4 = vld [vmem:[#allocation2] sm:$0xff]  ;;  %vm37_vm1 = vcmask 130048   ;;  %s638_s0 = smov [#allocation5]  }
  0x10   :  { %538 = vmatprep.subr.mxu0 %v636_v1  ;;  %549 = vmatprep.mubr.msk.f32.mxu1 %vm637_vm0, %v636_v1  ;;  %v70_v5 = vand.u32 4294901760, %v36_v3  ;;  %v73_v6 = vand.u32 4294901760, %v35_v4  ;;  %v28_v16 = vand.u32 127, %v27_v15  ;;  %s507_s1 = sshll.u32 %s638_s0, 4  ;;  %s508_s1 = int_to_ptr.vmem [resolvable:$true] %s507_s1 }
  0x11   :  { %542 = vmatprep.mubr.msk.f32.mxu0 %vm637_vm0, %v636_v1  ;;  %30 = vperm.xlu0 %587, %v26_v2   ;;  %s608_s18 = scalar_lea.vmem %s508_s1, 128  ;;  %p613_p6 = scmp.lt.s32.totalorder %s508_s1, %s508_s1 }
  0x12   :  { %v148_v7 = vsub.f32 %v36_v3, %v70_v5  ;;  %v155_v8 = vsub.f32 %v35_v4, %v73_v6  ;;  %539 = vmatpush3.msra.mxu0 %v70_v5  ;;  %p609_p5 = scmp.ne.s32.totalorder %s508_s1, %s608_s18  ;;  %p614_p7 = scmp.lt.s32.totalorder %s608_s18, %s608_s18 }
  0x13   :  { %540 = vmatprep.subr.mxu0 %v636_v1 }
  0x14   :  { %v149_v9 = vand.u32 4294901760, %v148_v7  ;;  %v156_v10 = vand.u32 4294901760, %v155_v8  ;;  %541 = vmatpush3.msra.mxu0 %v73_v6  ;;  %p615_p8 = por %p614_p7, %p613_p6 }
  0x15   :  { %552 = vmatprep.subr.mxu0 %v636_v1 }
  0x16   :  { %v150_v11 = vsub.f32 %v148_v7, %v149_v9  ;;  %v157_v12 = vsub.f32 %v155_v8, %v156_v10  ;;  %p616_p9 = pnand %p615_p8, %p609_p5 }
  0x18   :  { %v151_v13 = vand.u32 4294901760, %v150_v11  ;;  %v158_v14 = vand.u32 4294901760, %v157_v12 }
  0x1a   :  { %546 = vmatpush3.msra.mxu1 %v151_v13 }
  0x1b   :  { %547 = vmatprep.subr.mxu1 %v636_v1 }
  0x1c   :  { %548 = vmatpush3.msra.mxu1 %v158_v14 }
  0x1d   :  { %559 = vmatprep.subr.mxu1 %v636_v1 }
  0x8c   :  { %v31_v17 = vpop.permute.xlu0 %30 }
  0x8d   :  { %vm32_vm2 = vcmp.eq.s32.totalorder %v28_v16, %v31_v17 }
  0x8e   :  { %v516_v18 = vsel %vm32_vm2, 1.0, %v636_v1 }
  0x8f   :  { %v39_v19 = vsel %vm37_vm1, %v516_v18, 0  ;;  %550 = vmatmul.mubr.msk.f32.vlgmr.msra.gmra.mxu1 %vm37_vm1, %v516_v18 }
  0x90   :  { %v109_v20 = vsub.f32 %v39_v19, %v39_v19  ;;  %560 = vmatpush3.msra.mxu1 %v70_v5  ;;  %563 = vmatprep.mubr.msk.f32.mxu1 %vm637_vm0, %v636_v1 }
  0x91   :  { %561 = vmatprep.subr.mxu1 %v636_v1 }
  0x92   :  { %562 = vmatpush3.msra.mxu1 %v73_v6  ;;  %v110_v21 = vand.u32 4294901760, %v109_v20 }
  0x93   :  { %573 = vmatprep.subr.mxu1 %v636_v1 }
  0x94   :  { %564 = vmatmul.mubr.f32.vlgmr.msra.gmra.mxu1 %v110_v21  ;;  %v111_v22 = vsub.f32 %v109_v20, %v110_v21 }
  0x95   :  { %574 = vmatpush3.msra.mxu1 %v70_v5  ;;  %577 = vmatprep.mubr.msk.f32.mxu1 %vm637_vm0, %v636_v1 }
  0x96   :  { %575 = vmatprep.subr.mxu1 %v636_v1  ;;  %v112_v23 = vand.u32 4294901760, %v111_v22 }
  0x97   :  { %576 = vmatpush3.msra.mxu1 %v73_v6 }
  0x98   :  { %543 = vmatmul.mubr.f32.vlgmr.msra.gmra.mxu0 %v112_v23  ;;  %578 = vmatmul.mubr.msk.f32.vlgmr.msra.gmra.mxu1 %vm37_vm1, %v516_v18 }
  0x99   :  { %553 = vmatpush3.msra.mxu0 %v148_v7  ;;  %556 = vmatprep.mubr.msk.f32.mxu0 %vm637_vm0, %v636_v1 }
  0x9a   :  { %554 = vmatprep.subr.mxu0 %v636_v1 }
  0x9b   :  { %555 = vmatpush3.msra.mxu0 %v155_v8 }
  0x9c   :  { %566 = vmatprep.subr.mxu0 %v636_v1  ;;  %557 = vmatmul.mubr.f32.vlgmr.msra.gmra.mxu0 %v109_v20 }
  0x9d   :  { %567 = vmatpush3.msra.mxu0 %v149_v9  ;;  %570 = vmatprep.mubr.msk.f32.mxu0 %vm637_vm0, %v636_v1 }
  0x9e   :  { %568 = vmatprep.subr.mxu0 %v636_v1 }
  0x9f   :  { %569 = vmatpush3.msra.mxu0 %v156_v10 }
  0xa0   :  { %571 = vmatmul.mubr.msk.f32.vlgmr.msra.gmra.mxu0 %vm37_vm1, %v516_v18 }
 0x14f   :  { %v195_v24 = vpop.f32.mrf.mxu1 }
 0x151   :  { %v551_v25 = vpop.f32.mrf.mxu1 }
 0x154   :  { %v346_v26 = vpop.f32.mrf.mxu1 }
 0x156   :  { %v565_v27 = vpop.f32.mrf.mxu1 }
 0x158   :  { %v114_v28 = vpop.f32.mrf.mxu0  ;;  %v496_v29 = vpop.f32.mrf.mxu1 }
 0x159   :  { %v196_v32 = vadd.f32 %v195_v24, %v114_v28 }
 0x15a   :  { %v544_v30 = vpop.f32.mrf.mxu0  ;;  %v579_v31 = vpop.f32.mrf.mxu1 }
 0x15c   :  { %v271_v33 = vpop.f32.mrf.mxu0 }
 0x15d   :  { %v272_v34 = vadd.f32 %v271_v33, %v196_v32 }
 0x15e   :  { %v558_v35 = vpop.f32.mrf.mxu0 }
 0x15f   :  { %v347_v36 = vadd.f32 %v346_v26, %v272_v34 }
 0x160   :  { %v423_v37 = vpop.f32.mrf.mxu0 }
 0x161   :  { %v424_v38 = vadd.f32 %v423_v37, %v347_v36 }
 0x162   :  { %v572_v39 = vpop.f32.mrf.mxu0 }
 0x163   :  { %v497_v40 = vadd.f32 %v496_v29, %v424_v38 }
 0x165   :  { %500 = vst [vmem:[#allocation5] sm:$0xff] %v497_v40 }
 0x166   :  { %619 = shalt.err (!%p616_p9)
}
 0x167   :  { %510 = dma.vmem_to_hbm [thread:$0]  %s508_s1, 128, %s675_s2, [#allocation4]  }
 0x168   :  { %630 = dma.done.wait [#allocation4], 128  }
 0x169   :  { %631 = vsyncadd [#allocation4], 4294967168 }
 0x16a   :  { %514 = vsyncpa [#allocation3], 1 }
 0x16b   :  { %515 = vsyncpa [#allocation4], 1 }

</bundles_post_ra>
